<compile_context>
chip_gen: v7x
topology: tpu7x:2x2x1
jax: 0.10.0
libtpu: 0.0.40
codegen_flags: <defaults>
</compile_context>

<pallas_src>
import functools

import jax
import jax.numpy as jnp
from jax.experimental import pallas as pl
from jax.experimental.pallas import tpu as pltpu


def _round_up(a, m):
    return ((a + m - 1) // m) * m


# ----------------------------------------------------------------------------
# Pallas conv2d kernel (stride=1, dilation=1, groups=1, no bias — the module's
# defaults used in this demo). Optional fused residual add on the output tile.
# ----------------------------------------------------------------------------
def _conv2d_kernel(x_ref, w_ref, *rest, KH, KW, TH, Wo):
    # x_ref  : (1, Hp_pad, Wp, Cin) bf16  — full padded image, one batch element
    # w_ref  : (KH*KW*Cin, Ct)      bf16  — flattened taps, one Cout tile
    # add_ref: (1, TH, Wo, Ct)      f32   — optional fused residual (same tiling as o_ref)
    # o_ref  : (1, TH, Wo, Ct)      f32   — one output row block / Cout tile
    if len(rest) == 2:
        add_ref, o_ref = rest
    else:
        add_ref = None
        (o_ref,) = rest

    rb = pl.program_id(1)
    h0 = pl.multiple_of(rb * TH, TH)

    # One dynamic-H slab load; kh/kw shifts are static slices of the value.
    slab = x_ref[0, pl.ds(h0, TH + KH - 1), :, :]          # (TH+KH-1, Wp, Cin)
    taps = [slab[kh:kh + TH, kw:kw + Wo, :]                 # each (TH, Wo, Cin)
            for kh in range(KH) for kw in range(KW)]
    patch = jnp.concatenate(taps, axis=-1)                  # (TH, Wo, KH*KW*Cin)
    patch = patch.reshape(TH * Wo, patch.shape[-1])         # M = TH*Wo

    acc = jnp.dot(patch, w_ref[...],                        # single MXU matmul
                  preferred_element_type=jnp.float32)       # f32 accumulate
    out = acc.reshape(1, TH, Wo, acc.shape[-1])
    if add_ref is not None:
        out = out + add_ref[...]                            # fused OctConv addition
    o_ref[...] = out.astype(o_ref.dtype)


def _choose_row_tile(Ho, Wo):
    # Target M = TH*Wo around 256 (fills MXU on v6e/v7x; fine on v5e),
    # TH a multiple of 8, not larger than the (rounded-up) output height.
    th = -(-256 // max(Wo, 1))                 # ceil(256 / Wo)
    th = _round_up(max(th, 8), 8)
    return min(th, _round_up(Ho, 8))


def pallas_conv2d_nhwc(x, w, padding=0, stride=1, add=None):
    """x: (B,H,W,Cin) f32, w: (KH,KW,Cin,Cout) f32 -> (B,Ho,Wo,Cout) f32.

    If `add` is given (shape (B,Ho,Wo,Cout) f32), it is added to the conv
    result inside the kernel epilogue (fused residual).
    """
    assert stride == 1, "only stride=1 (module default) is supported"
    B, H, W, Cin = x.shape
    KH, KW, Cin_w, Cout = w.shape
    assert Cin_w == Cin

    Ho = H + 2 * padding - KH + 1
    Wo = W + 2 * padding - KW + 1
    TH = _choose_row_tile(Ho, Wo)
    Ho_pad = _round_up(Ho, TH)
    n_rb = Ho_pad // TH
    Wp = W + 2 * padding
    Hp_pad = Ho_pad + KH - 1
    extra_h = Ho_pad - Ho                       # bottom rows to make TH divide H

    # Zero-pad once (conv padding + row-tile remainder), cast to bf16 for MXU.
    xp = jnp.pad(x, ((0, 0), (padding, padding + extra_h),
                     (padding, padding), (0, 0))).astype(jnp.bfloat16)
    wf = w.reshape(KH * KW * Cin, Cout).astype(jnp.bfloat16)

    # Cout tiling: 128-lane tiles when possible, else the full (small) Cout.
    Ct = 128 if (Cout % 128 == 0) else Cout
    n_co = Cout // Ct

    kernel = functools.partial(_conv2d_kernel, KH=KH, KW=KW, TH=TH, Wo=Wo)

    in_specs = [
        # Full padded image per batch element; block index constant across
        # (rb, co) so it stays resident (no re-DMA across row/Cout tiles).
        pl.BlockSpec((1, Hp_pad, Wp, Cin), lambda b, rb, co: (b, 0, 0, 0)),
        pl.BlockSpec((KH * KW * Cin, Ct), lambda b, rb, co: (0, co)),
    ]
    args = [xp, wf]
    if add is not None:
        assert add.shape == (B, Ho, Wo, Cout), f"add shape {add.shape}"
        add_p = add.astype(jnp.float32)
        if extra_h:
            add_p = jnp.pad(add_p, ((0, 0), (0, extra_h), (0, 0), (0, 0)))
        in_specs.append(
            pl.BlockSpec((1, TH, Wo, Ct), lambda b, rb, co: (b, rb, 0, co)))
        args.append(add_p)

    out = pl.pallas_call(
        kernel,
        out_shape=jax.ShapeDtypeStruct((B, Ho_pad, Wo, Cout), jnp.float32),
        grid=(B, n_rb, n_co),
        in_specs=in_specs,
        out_specs=pl.BlockSpec((1, TH, Wo, Ct), lambda b, rb, co: (b, rb, 0, co)),
        compiler_params=pltpu.CompilerParams(
            dimension_semantics=("parallel", "parallel", "parallel"),
            vmem_limit_bytes=48 * 1024 * 1024),
    )(*args)
    return out[:, :Ho] if Ho_pad != Ho else out


# ----------------------------------------------------------------------------
# Plain-JAX glue (cheap data movement: pooling / upsampling / layout transposes)
# ----------------------------------------------------------------------------
def avg_pool2x2_nhwc(x):
    B, H, W, C = x.shape
    return x.reshape(B, H // 2, 2, W // 2, 2, C).mean(axis=(2, 4))


def avg_pool2x2_nchw(x):
    B, C, H, W = x.shape
    return x.reshape(B, C, H // 2, 2, W // 2, 2).mean(axis=(3, 5))


def upsample2x_nearest_nhwc(x):
    return jnp.repeat(jnp.repeat(x, 2, axis=1), 2, axis=2)


def to_nhwc(x):
    return jnp.transpose(x, (0, 2, 3, 1))


def to_nchw(x):
    return jnp.transpose(x, (0, 3, 1, 2))


# ----------------------------------------------------------------------------
# OctConv2d module (mirrors the PyTorch module's forward semantics; NCHW I/O)
# ----------------------------------------------------------------------------
class OctConv2dPallas:
    def __init__(self, key, in_channels, out_channels, kernel_size, padding=0,
                 stride=1, alpha=0.5, dilation=1, groups=1, bias=False):
        assert stride == 1 and dilation == 1 and groups == 1 and not bias
        if isinstance(alpha, tuple):
            assert len(alpha) == 2
            self.alpha_in, self.alpha_out = alpha
        else:
            self.alpha_in, self.alpha_out = (alpha, alpha)
        self.kernel_size = kernel_size
        self.padding = padding
        self.stride = stride

        in_ch_hf = int((1 - self.alpha_in) * in_channels)
        self.in_channels = {'high': in_ch_hf, 'low': in_channels - in_ch_hf}
        out_ch_hf = int((1 - self.alpha_out) * out_channels)
        self.out_channels = {'high': out_ch_hf, 'low': out_channels - out_ch_hf}

        def make_w(k, cin, cout):
            # deterministic, PyTorch-Conv2d-like uniform init; stored (KH,KW,Cin,Cout)
            bound = 1.0 / (cin * kernel_size * kernel_size) ** 0.5
            return jax.random.uniform(k, (kernel_size, kernel_size, cin, cout),
                                      jnp.float32, -bound, bound)

        k0, k1, k2, k3 = jax.random.split(key, 4)
        self.W_L2L = self.W_L2H = self.W_H2L = self.W_H2H = None
        if not (self.in_channels['low'] == 0 or self.out_channels['low'] == 0):
            self.W_L2L = make_w(k0, self.in_channels['low'], self.out_channels['low'])
        if not (self.in_channels['low'] == 0 or self.out_channels['high'] == 0):
            self.W_L2H = make_w(k1, self.in_channels['low'], self.out_channels['high'])
        if not (self.in_channels['high'] == 0 or self.out_channels['low'] == 0):
            self.W_H2L = make_w(k2, self.in_channels['high'], self.out_channels['low'])
        if not (self.in_channels['high'] == 0 or self.out_channels['high'] == 0):
            self.W_H2H = make_w(k3, self.in_channels['high'], self.out_channels['high'])

    def _split(self, x):
        if isinstance(x, tuple):
            hf, lf = x
        else:
            hf, lf = x, avg_pool2x2_nchw(x)
        return hf, lf

    def forward(self, x):
        hf, lf = self._split(x)                 # NCHW
        hf_h = to_nhwc(hf)

        # --- low-frequency input branch first (its results are fused as
        #     residual adds into the high-frequency-input convs below) -------
        l2l = l2h_up = None
        if self.W_L2L is not None or self.W_L2H is not None:
            lf_h = to_nhwc(lf)
            if self.W_L2L is not None and self.W_L2H is not None:
                # Fuse L2L + L2H: same input / spatial size -> one conv call
                # with weights concatenated along Cout, then split the output.
                w_fused = jnp.concatenate([self.W_L2L, self.W_L2H], axis=3)
                out = pallas_conv2d_nhwc(lf_h, w_fused, self.padding)
                c_low = self.out_channels['low']
                l2l = out[..., :c_low]
                l2h_up = upsample2x_nearest_nhwc(out[..., c_low:])
            elif self.W_L2L is not None:
                l2l = pallas_conv2d_nhwc(lf_h, self.W_L2L, self.padding)
            else:
                l2h_up = upsample2x_nearest_nhwc(
                    pallas_conv2d_nhwc(lf_h, self.W_L2H, self.padding))

        # --- high-frequency output: h2h conv with fused "+ upsample(l2h)" ---
        hf_ = None
        if self.W_H2H is not None:
            hf_ = pallas_conv2d_nhwc(hf_h, self.W_H2H, self.padding, add=l2h_up)
        elif l2h_up is not None:
            hf_ = l2h_up

        # --- low-frequency output: h2l conv with fused "+ l2l" --------------
        lf_ = None
        if self.W_H2L is not None:
            lf_ = pallas_conv2d_nhwc(avg_pool2x2_nhwc(hf_h), self.W_H2L,
                                     self.padding, add=l2l)
        elif l2l is not None:
            lf_ = l2l

        return (to_nchw(hf_) if hf_ is not None else None,
                to_nchw(lf_) if lf_ is not None else None)


# ----------------------------------------------------------------------------
# Pure-JAX (lax.conv) reference, NCHW throughout — used for validation only.
# Inputs are rounded to bf16 (matching the kernel's operand precision) and the
# conv runs at HIGHEST precision with f32 accumulation, so the comparison is
# tight (only accumulation-order differences remain).
# ----------------------------------------------------------------------------
def _bf16_round(a):
    return a.astype(jnp.bfloat16).astype(jnp.float32)


def _ref_conv_nchw(x, w, padding):
    w_oihw = jnp.transpose(_bf16_round(w), (3, 2, 0, 1))
    return jax.lax.conv_general_dilated(
        _bf16_round(x), w_oihw, (1, 1),
        [(padding, padding), (padding, padding)],
        dimension_numbers=('NCHW', 'OIHW', 'NCHW'),
        precision=jax.lax.Precision.HIGHEST,
        preferred_element_type=jnp.float32)


def _ref_upsample_nchw(x):
    return jnp.repeat(jnp.repeat(x, 2, axis=2), 2, axis=3)


def ref_forward(m, x):
    if isinstance(x, tuple):
        hf, lf = x
    else:
        hf, lf = x, avg_pool2x2_nchw(x)
    h2h = _ref_conv_nchw(hf, m.W_H2H, m.padding) if m.W_H2H is not None else None
    l2l = _ref_conv_nchw(lf, m.W_L2L, m.padding) if m.W_L2L is not None else None
    h2l = (_ref_conv_nchw(avg_pool2x2_nchw(hf), m.W_H2L, m.padding)
           if m.W_H2L is not None else None)
    l2h = (_ref_upsample_nchw(_ref_conv_nchw(lf, m.W_L2H, m.padding))
           if m.W_L2H is not None else None)
    hf_ = lf_ = None
    for i in (h2h, l2h):
        if i is not None:
            hf_ = i if hf_ is None else hf_ + i
    for i in (l2l, h2l):
        if i is not None:
            lf_ = i if lf_ is None else lf_ + i
    return hf_, lf_


def _check(a, b, name):
    assert a.shape == b.shape, f"{name}: shape {a.shape} vs {b.shape}"
    assert jnp.allclose(a, b, rtol=1e-3, atol=1e-3), \
        f"{name}: max abs err {jnp.max(jnp.abs(a - b))}"


if __name__ == "__main__":
    key = jax.random.PRNGKey(0)
    k_w1, k_w2, k_x, k_hf, k_lf = jax.random.split(key, 5)

    B, Cin, H, W = 2, 4, 16, 16
    Cout, ksz, pad = 4, 3, 1

    # --- Case 1: "first layer" — plain NCHW tensor input, alpha=(0.0, 0.5) ---
    x = jax.random.normal(k_x, (B, Cin, H, W), jnp.float32)
    m1 = OctConv2dPallas(k_w1, Cin, Cout, ksz, padding=pad, alpha=(0.0, 0.5))
    hf1, lf1 = m1.forward(x)
    rhf1, rlf1 = ref_forward(m1, x)
    jax.block_until_ready((hf1, lf1))
    _check(hf1, rhf1, "case1 hf")
    _check(lf1, rlf1, "case1 lf")

    # --- Case 2: tuple input (hf, lf), alpha=0.5 — exercises all 4 conv paths ---
    m2 = OctConv2dPallas(k_w2, Cin, Cout, ksz, padding=pad, alpha=0.5)
    hf_in = jax.random.normal(k_hf, (B, m2.in_channels['high'], H, W), jnp.float32)
    lf_in = jax.random.normal(k_lf, (B, m2.in_channels['low'], H // 2, W // 2),
                              jnp.float32)
    hf2, lf2 = m2.forward((hf_in, lf_in))
    rhf2, rlf2 = ref_forward(m2, (hf_in, lf_in))
    jax.block_until_ready((hf2, lf2))
    _check(hf2, rhf2, "case2 hf")
    _check(lf2, rlf2, "case2 lf")

    print("KERNEL_OK")
</pallas_src>

<mosaic_0001>
module attributes {stable_mosaic.version = 11 : i64} {
  func.func @_conv2d_kernel(%arg0: i32, %arg1: i32, %arg2: i32, %arg3: memref<1x18x18x4xbf16, #tpu.memory_space<vmem>>, %arg4: memref<36x2xbf16, #tpu.memory_space<vmem>>, %arg5: memref<1x16x16x2xf32, #tpu.memory_space<vmem>>) attributes {dimension_semantics = [#tpu.dimension_semantics<parallel>, #tpu.dimension_semantics<parallel>, #tpu.dimension_semantics<parallel>], iteration_bounds = array<i64: 2, 1, 1>, scalar_prefetch = 0 : i64, scratch_operands = 0 : i64, tpu.core_type = #tpu.core_type<tc>, window_params = [{transform_indices = @transform_0, window_bounds = array<i64: 1, 18, 18, 4>}, {transform_indices = @transform_1, window_bounds = array<i64: 36, 2>}, {transform_indices = @transform_2, window_bounds = array<i64: 1, 16, 16, 2>}]} {
    %c16_i32 = arith.constant 16 : i32
    %0 = arith.muli %arg1, %c16_i32 : i32
    %1 = tpu.assume_multiple %0, 16 : i32
    %c0 = arith.constant 0 : index
    %2 = arith.index_cast %1 : i32 to index
    %c0_0 = arith.constant 0 : index
    %c0_1 = arith.constant 0 : index
    %3 = vector.load %arg3[%c0, %2, %c0_0, %c0_1] : memref<1x18x18x4xbf16, #tpu.memory_space<vmem>>, vector<1x18x18x4xbf16>
    %4 = vector.shape_cast %3 : vector<1x18x18x4xbf16> to vector<18x18x4xbf16>
    %5 = vector.extract_strided_slice %4 {offsets = [0, 0, 0], sizes = [16, 16, 4], strides = [1, 1, 1]} : vector<18x18x4xbf16> to vector<16x16x4xbf16>
    %6 = vector.extract_strided_slice %4 {offsets = [0, 1, 0], sizes = [16, 16, 4], strides = [1, 1, 1]} : vector<18x18x4xbf16> to vector<16x16x4xbf16>
    %7 = vector.extract_strided_slice %4 {offsets = [0, 2, 0], sizes = [16, 16, 4], strides = [1, 1, 1]} : vector<18x18x4xbf16> to vector<16x16x4xbf16>
    %8 = vector.extract_strided_slice %4 {offsets = [1, 0, 0], sizes = [16, 16, 4], strides = [1, 1, 1]} : vector<18x18x4xbf16> to vector<16x16x4xbf16>
    %9 = vector.extract_strided_slice %4 {offsets = [1, 1, 0], sizes = [16, 16, 4], strides = [1, 1, 1]} : vector<18x18x4xbf16> to vector<16x16x4xbf16>
    %10 = vector.extract_strided_slice %4 {offsets = [1, 2, 0], sizes = [16, 16, 4], strides = [1, 1, 1]} : vector<18x18x4xbf16> to vector<16x16x4xbf16>
    %11 = vector.extract_strided_slice %4 {offsets = [2, 0, 0], sizes = [16, 16, 4], strides = [1, 1, 1]} : vector<18x18x4xbf16> to vector<16x16x4xbf16>
    %12 = vector.extract_strided_slice %4 {offsets = [2, 1, 0], sizes = [16, 16, 4], strides = [1, 1, 1]} : vector<18x18x4xbf16> to vector<16x16x4xbf16>
    %13 = vector.extract_strided_slice %4 {offsets = [2, 2, 0], sizes = [16, 16, 4], strides = [1, 1, 1]} : vector<18x18x4xbf16> to vector<16x16x4xbf16>
    %14 = tpu.concatenate %5, %6, %7, %8, %9, %10, %11, %12, %13 in 2 : vector<16x16x4xbf16>, vector<16x16x4xbf16>, vector<16x16x4xbf16>, vector<16x16x4xbf16>, vector<16x16x4xbf16>, vector<16x16x4xbf16>, vector<16x16x4xbf16>, vector<16x16x4xbf16>, vector<16x16x4xbf16> -> vector<16x16x36xbf16>
    %15 = vector.shape_cast %14 : vector<16x16x36xbf16> to vector<256x36xbf16>
    %c0_2 = arith.constant 0 : index
    %c0_3 = arith.constant 0 : index
    %16 = vector.load %arg4[%c0_2, %c0_3] : memref<36x2xbf16, #tpu.memory_space<vmem>>, vector<36x2xbf16>
    %cst = arith.constant dense<0.000000e+00> : vector<256x2xf32>
    %17 = tpu.matmul %15, %16, %cst {dimension_numbers = #tpu.dot_dimension_numbers<[1], [0], [0], [1], [0, 0, 1, 1], [], []>} : vector<256x36xbf16>, vector<36x2xbf16>, vector<256x2xf32> -> vector<256x2xf32>
    %18 = vector.shape_cast %17 : vector<256x2xf32> to vector<1x16x16x2xf32>
    %c0_4 = arith.constant 0 : index
    %c0_5 = arith.constant 0 : index
    %c0_6 = arith.constant 0 : index
    %c0_7 = arith.constant 0 : index
    %19 = vector.load %arg5[%c0_4, %c0_5, %c0_6, %c0_7] : memref<1x16x16x2xf32, #tpu.memory_space<vmem>>, vector<1x16x16x2xf32>
    tpu.vector_store %arg5[%c0_4, %c0_5, %c0_6, %c0_7], %18 {strides = array<i32>} : memref<1x16x16x2xf32, #tpu.memory_space<vmem>>, vector<1x16x16x2xf32>,
    return
  }
  func.func @transform_0(%arg0: i32, %arg1: i32, %arg2: i32) -> (i32, i32, i32, i32) {
    %c0_i32 = arith.constant 0 : i32
    %c0_i32_0 = arith.constant 0 : i32
    %c0_i32_1 = arith.constant 0 : i32
    %c0_i32_2 = arith.constant 0 : i32
    return %arg0, %c0_i32, %c0_i32_0, %c0_i32_1 : i32, i32, i32, i32
  }
  func.func @transform_1(%arg0: i32, %arg1: i32, %arg2: i32) -> (i32, i32) {
    %c0_i32 = arith.constant 0 : i32
    %c0_i32_0 = arith.constant 0 : i32
    return %c0_i32, %arg2 : i32, i32
  }
  func.func @transform_2(%arg0: i32, %arg1: i32, %arg2: i32) -> (i32, i32, i32, i32) {
    %c0_i32 = arith.constant 0 : i32
    %c0_i32_0 = arith.constant 0 : i32
    return %arg0, %arg1, %c0_i32, %arg2 : i32, i32, i32, i32
  }
}

</mosaic_0001>

<bundles_post_ra>
// kernel: tpu_custom_call.1
= control target key start
LH: loop header
LB: loop body
LE: loop exit
PB: predicated region body
PF: predicated region fallthrough
CT: control target
= control target key end

     0   :  { %s1816_s9 = smov 0   ;;  %s1818_s10 = smov 0   ;;  %s2582_s0 = inlined_call_operand.vmem [shape: bf16[2,18,18,4], index: 0, kind: input, shape index: {}]   ;;  %s2583_s1 = inlined_call_operand.vmem [shape: bf16[36,2], index: 1, kind: input, shape index: {}]   ;;  %s2584_s2 = inlined_call_operand.vmem [shape: f32[2,16,16,2], index: 2, kind: output, shape index: {}]  }
   0x1   :  { %s1820_s11 = smov 0  }
   0x2 LB: > { %s31_s12 = sadd.s32 1, %s1787_s10  ;;  %p1569_p0 = scmp.ge.s32.totalorder %s1791_s11, 1  ;;  %s1791_s11 = sphi %s1820_s11, %s12_s11   ;;  %s1787_s10 = sphi %s1818_s10, %s2586_s10   ;;  %s1783_s9 = sphi %s1816_s9, %s2585_s9  }
   0x3   : > { %p33_p1 = scmp.ge.s32.totalorder %s31_s12, 2  ;;  %p144_p2 = scmp.lt.s32.totalorder %s1791_s11, 3 }
   0x5   : > { %s2588_s12 = smov (%p33_p1, %s31_s12), 0  ;;  %p145_p3 = pnand %p1569_p0, %p144_p2 }
   0x6   : > { %p178_p4 = scmp.lt.s32.totalorder (!%p145_p3), %s1783_s9, 1  ;;  %vm613_vm0 = vcmask (!%p145_p3), 1046528   ;;  %s1793_s17 = smov (!%p145_p3), 12   ;;  %vm388_vm1 = vsmask.f32 (!%p145_p3), 7424  ;;  %vm1249_vm2 = vcmask (!%p145_p3), 1041408  }
   0x7   : > { %148 = sbr.rel (%p145_p3) target bundleno = 604 (0x25c), region = 28  ;;  %s1794_s18 = smov (!%p145_p3), 8   ;;  %vm932_vm3 = vcmask (!%p145_p3), 31744   ;;  %vm965_vm4 = vcmask (!%p145_p3), 64512   ;;  %vm1031_vm5 = vcmask (!%p145_p3), 130048   ;;  %vm998_vm6 = vcmask (!%p145_p3), 97280  }
   0x8   : > { %s1795_s19 = smov (!%p145_p3), 4   ;;  %s1796_s20 = smov (!%p145_p3), 16   ;;  %vm1064_vm7 = vcmask (!%p145_p3), 162816   ;;  %vm1097_vm8 = vcmask (!%p145_p3), 195584   ;;  %vm1130_vm9 = vcmask (!%p145_p3), 228352   ;;  %vm1163_vm10 = vcmask (!%p145_p3), 261120  }
   0x9   : > { %s1797_s21 = smov (!%p145_p3), 20   ;;  %s1798_s22 = smov (!%p145_p3), 24   ;;  %vm1216_vm11 = vcmask (!%p145_p3), 293888   ;;  %vm1414_vm12 = vcmask (!%p145_p3), 15360  }
   0xa   : > { %s1799_s27 = smov (!%p145_p3), 28   ;;  %s1800_s30 = smov (!%p145_p3), 32  }
   0xe   : > { %s2590_s9 = smov (!%p178_p4, %s1783_s9), 1 }
   0xf   : > { %s1696_s13 = smul.u32 216, %s2590_s9  ;;  %s1630_s3 = sshll.u32 %s2590_s9, 8 }
  0x10   : > { %s2507_s6 = scalar_lea.vmem %s2584_s2, %s1630_s3 }
  0x11   : > { %s1840_s16 = scalar_lea.vmem %s2582_s0, %s1696_s13 }
  0x12   : > { %v1843_v0 = vld [vmem:[%s1840_s16 + $0x6c] sm:$0xff]   ;;  %v1853_v2 = vld [vmem:[%s1840_s16 + $0x60] sm:$0xff]   ;;  %v1732_v3 = vld [vmem:[%s1840_s16 + $0x68] ss:$0 sps:$4 sm:$0x11]  }
  0x13   : > { %v1846_v1 = vld [vmem:[%s1840_s16 + $0xc] sm:$0xff]   ;;  %715 = vrot.lane.b32.xlu1 %v1843_v0, %s1793_s17  ;;  %v1857_v4 = vld [vmem:[%s1840_s16] sm:$0xff]   ;;  %v641_v5 = vrot.slane %v1843_v0, 1  ;;  %v638_v6 = vrot.slane %v1853_v2, 1  ;;  %v639_v7 = vrot.slane %v1732_v3, 1  ;;  %v498_v26 = vshrl.u32 %v1843_v0, 16 }
  0x14   : > { %699 = vrot.lane.b32.xlu0 %v1846_v1, %s1793_s17  ;;  %v1734_v8 = vld [vmem:[%s1840_s16 + $0x8] ss:$0 sps:$4 sm:$0x11]   ;;  %v617_v9 = vrot.slane %v1846_v1, 1  ;;  %v614_v10 = vrot.slane %v1857_v4, 1  ;;  %v402_v16 = vshrl.u32 %v1846_v1, 16 }
  0x15   : > { %v1735_v11 = vld [vmem:[%s1840_s16 + $0x74] ss:$0 sps:$4 sm:$0x11]   ;;  %v1866_v12 = vsel %vm613_vm0, %v638_v6, %v639_v7  ;;  %v615_v13 = vrot.slane %v1734_v8, 1  ;;  %v404_v17 = vshll.u32 %v1846_v1, 16  ;;  %v390_v18 = vshrl.u32 %v1857_v4, 16 }
  0x16   : > { %v1736_v14 = vld [vmem:[%s1840_s16 + $0x14] ss:$0 sps:$4 sm:$0x11]   ;;  %v642_v15 = vrot.slane %v1735_v11, 1  ;;  %v392_v22 = vshll.u32 %v1857_v4, 16  ;;  %v397_v25 = vshll.u32 %v1734_v8, 16 }
  0x17   : > { %678 = vrot.lane.b32.xlu1 %v1866_v12, %s1794_s18  ;;  %v616_v19 = vsel %vm613_vm0, %v614_v10, %v615_v13  ;;  %v618_v20 = vrot.slane %v1736_v14, 1  ;;  %v409_v21 = vshll.u32 %v1736_v14, 16  ;;  %v406_v24 = vrot.slane %v404_v17, 1  ;;  %v1888_v39 = vld [vmem:[%s1840_s16 + $0x78] sm:$0xff]   ;;  %v1936_v10 = vld [vmem:[%s1840_s16 + $0x84] sm:$0xff]  }
  0x18   : > { %662 = vrot.lane.b32.xlu0 %v616_v19, %s1794_s18  ;;  %v1878_v23 = vsel %vm613_vm0, %v641_v5, %v642_v15  ;;  %v394_v29 = vrot.slane %v392_v22, 1  ;;  %v500_v30 = vshll.u32 %v1843_v0, 16  ;;  %v399_v32 = vrot.slane %v397_v25, 1  ;;  %v1894_v46 = vld [vmem:[%s1840_s16 + $0x18] sm:$0xff]   ;;  %v1946_v14 = vld [vmem:[%s1840_s16 + $0x24] sm:$0xff]  }
  0x19   : > { %v619_v27 = vsel %vm613_vm0, %v617_v9, %v618_v20  ;;  %v411_v28 = vrot.slane %v409_v21, 1  ;;  %v407_v31 = vor.u32 %v406_v24, %v402_v16  ;;  %v505_v33 = vshll.u32 %v1735_v11, 16  ;;  %v1739_v47 = vld [vmem:[%s1840_s16 + $0x80] ss:$0 sps:$4 sm:$0x11]  }
  0x1a   : > { %v486_v34 = vshrl.u32 %v1853_v2, 16  ;;  %v395_v35 = vor.u32 %v394_v29, %v390_v18  ;;  %v502_v36 = vrot.slane %v500_v30, 1  ;;  %v488_v37 = vshll.u32 %v1853_v2, 16  ;;  %v1740_v52 = vld [vmem:[%s1840_s16 + $0x20] ss:$0 sps:$4 sm:$0x11]  }
  0x1b   : > { %680 = vrot.lane.b32.xlu1 %v1878_v23, %s1794_s18  ;;  %v493_v38 = vshll.u32 %v1732_v3, 16  ;;  %v412_v40 = vsel %vm388_vm1, %v407_v31, %v411_v28  ;;  %v507_v41 = vrot.slane %v505_v33, 1  ;;  %v512_v50 = vshll.u32 %v1888_v39, 16  ;;  %v1743_v15 = vld [vmem:[%s1840_s16 + $0x8c] ss:$0 sps:$4 sm:$0x11]  }
  0x1c   : > { %664 = vrot.lane.b32.xlu0 %v619_v27, %s1794_s18  ;;  %v400_v42 = vsel %vm388_vm1, %v395_v35, %v399_v32  ;;  %v503_v43 = vor.u32 %v502_v36, %v498_v26  ;;  %v490_v44 = vrot.slane %v488_v37, 1  ;;  %v416_v53 = vshll.u32 %v1894_v46, 16  ;;  %v1744_v18 = vld [vmem:[%s1840_s16 + $0x2c] ss:$0 sps:$4 sm:$0x11]   ;;  %v1757_v22 = vld [vmem:[%s2583_s1] sm:$0xff]  }
  0x1d   : > { %v495_v45 = vrot.slane %v493_v38, 1  ;;  %v510_v54 = vshrl.u32 %v1888_v39, 16  ;;  %v514_v55 = vrot.slane %v512_v50, 1  ;;  %v517_v56 = vshll.u32 %v1739_v47, 16  ;;  %1650 = vmatprep.subr.bf16.mxu0 %v1757_v22  ;;  %1688 = vmatprep.subr.bf16.mxu1 %v1757_v22 }
  0x1e   : > { %v1899_v48 = vsel %vm388_vm1, %v503_v43, %v507_v41  ;;  %v491_v49 = vor.u32 %v490_v44, %v486_v34  ;;  %v414_v57 = vshrl.u32 %v1894_v46, 16  ;;  %v418_v58 = vrot.slane %v416_v53, 1  ;;  %1651 = vmatpush3.bf16.msra.mxu0 %v1757_v22  ;;  %1691 = vmatpush3.bf16.msra.mxu1 %v1757_v22  ;;  %v1761_v32 = vld [vmem:[%s2583_s1 + $0x10] ss:$0 sps:$4 sm:$0x33]  }
  0x1f   : > { %583 = vrot.lane.b32.xlu1 %v412_v40, %s1795_s19  ;;  %v421_v59 = vshll.u32 %v1740_v52, 16  ;;  %v515_v60 = vor.u32 %v514_v55, %v510_v54  ;;  %v519_v61 = vrot.slane %v517_v56, 1  ;;  %v644_v6 = vrot.slane %v1888_v39, 1  ;;  %v2002_v43 = vld [vmem:[%s1840_s16 + $0x90] sm:$0xff]  }
  0x20   : > { %581 = vrot.lane.b32.xlu0 %v400_v42, %s1795_s19  ;;  %v1904_v51 = vsel %vm388_vm1, %v491_v49, %v495_v45  ;;  %v419_v62 = vor.u32 %v418_v58, %v414_v57  ;;  %v645_v7 = vrot.slane %v1739_v47, 1  ;;  %v620_v8 = vrot.slane %v1894_v46, 1  ;;  %v2007_v44 = vld [vmem:[%s1840_s16 + $0x30] sm:$0xff]   ;;  %v1747_v45 = vld [vmem:[%s1840_s16 + $0x98] ss:$0 sps:$4 sm:$0x11]  }
  0x21   : > { %v423_v63 = vrot.slane %v421_v59, 1  ;;  %v1921_v3 = vsel %vm388_vm1, %v515_v60, %v519_v61  ;;  %v621_v9 = vrot.slane %v1740_v52, 1  ;;  %v524_v16 = vshll.u32 %v1936_v10, 16  ;;  %v1748_v49 = vld [vmem:[%s1840_s16 + $0x38] ss:$0 sps:$4 sm:$0x11]  }
  0x22   : > { %v1939_v11 = vsel %vm613_vm0, %v644_v6, %v645_v7  ;;  %v522_v17 = vshrl.u32 %v1936_v10, 16  ;;  %v529_v19 = vshll.u32 %v1743_v15, 16  ;;  %v428_v20 = vshll.u32 %v1946_v14, 16 }
  0x23   : > { %599 = vrot.lane.b32.xlu1 %v1899_v48, %s1795_s19  ;;  %v1925_v5 = vsel %vm388_vm1, %v419_v62, %v423_v63  ;;  %v1943_v13 = vsel %vm613_vm0, %v620_v8, %v621_v9  ;;  %v526_v21 = vrot.slane %v524_v16, 1  ;;  %v426_v24 = vshrl.u32 %v1946_v14, 16  ;;  %v2036_v9 = vld [vmem:[%s1840_s16 + $0x9c] sm:$0xff]  }
  0x24   : > { %597 = vrot.lane.b32.xlu0 %v1904_v51, %s1795_s19  ;;  %v430_v25 = vrot.slane %v428_v20, 1  ;;  %v433_v26 = vshll.u32 %v1744_v18, 16  ;;  %v531_v29 = vrot.slane %v529_v19, 1  ;;  %v1251_v34 = vsel %vm1249_vm2, %v1761_v32, 0 }
  0x25   : > { %v527_v28 = vor.u32 %v526_v21, %v522_v17  ;;  %v647_v36 = vrot.slane %v1936_v10, 1  ;;  %v648_v37 = vrot.slane %v1743_v15, 1  ;;  %v623_v38 = vrot.slane %v1946_v14, 1  ;;  %v1751_v15 = vld [vmem:[%s1840_s16 + $0xa4] ss:$0 sps:$4 sm:$0x11]  }
  0x26   : > { %v431_v30 = vor.u32 %v430_v25, %v426_v24  ;;  %v435_v31 = vrot.slane %v433_v26, 1  ;;  %v536_v47 = vshll.u32 %v2002_v43, 16  ;;  %v440_v50 = vshll.u32 %v2007_v44, 16  ;;  %v1752_v17 = vld [vmem:[%s1840_s16 + $0x44] ss:$0 sps:$4 sm:$0x11]  }
  0x27   : > { %717 = vrot.lane.b32.xlu1 %v1888_v39, %s1793_s17  ;;  %v532_v33 = vsel %vm388_vm1, %v527_v28, %v531_v29  ;;  %v649_v41 = vsel %vm613_vm0, %v647_v36, %v648_v37  ;;  %v534_v52 = vshrl.u32 %v2002_v43, 16  ;;  %v541_v54 = vshll.u32 %v1747_v45, 16 }
  0x28   : > { %701 = vrot.lane.b32.xlu0 %v1894_v46, %s1793_s17  ;;  %v436_v35 = vsel %vm388_vm1, %v431_v30, %v435_v31  ;;  %v538_v53 = vrot.slane %v536_v47, 1  ;;  %v438_v55 = vshrl.u32 %v2007_v44, 16  ;;  %v442_v56 = vrot.slane %v440_v50, 1 }
  0x29   : > { %v445_v57 = vshll.u32 %v1748_v49, 16  ;;  %v543_v59 = vrot.slane %v541_v54, 1  ;;  %v626_v6 = vrot.slane %v2007_v44, 1  ;;  %v627_v7 = vrot.slane %v1748_v49, 1 }
  0x2a   : > { %v539_v58 = vor.u32 %v538_v53, %v534_v52  ;;  %v443_v60 = vor.u32 %v442_v56, %v438_v55  ;;  %v548_v16 = vshll.u32 %v2036_v9, 16  ;;  %v546_v19 = vshrl.u32 %v2036_v9, 16  ;;  %v2102_v56 = vld [vmem:[%s1840_s16 + $0xa8] sm:$0xff]  }
  0x2b   : > { %762 = vrot.lane.b32.xlu1 %v1899_v48, %s1796_s20  ;;  %v447_v61 = vrot.slane %v445_v57, 1  ;;  %v553_v21 = vshll.u32 %v1751_v15, 16  ;;  %v457_v25 = vshll.u32 %v1752_v17, 16  ;;  %v653_v36 = vrot.slane %v2036_v9, 1 }
  0x2c   : > { %746 = vrot.lane.b32.xlu0 %v412_v40, %s1796_s20  ;;  %v624_v40 = vrot.slane %v1744_v18, 1  ;;  %v544_v62 = vsel %vm388_vm1, %v539_v58, %v543_v59  ;;  %v550_v20 = vrot.slane %v548_v16, 1  ;;  %v654_v37 = vrot.slane %v1751_v15, 1  ;;  %v2108_v58 = vld [vmem:[%s1840_s16 + $0x48] sm:$0xff]  }
  0x2d   : > { %v448_v63 = vsel %vm388_vm1, %v443_v60, %v447_v61  ;;  %v459_v29 = vrot.slane %v457_v25, 1  ;;  %v1755_v60 = vld [vmem:[%s1840_s16 + $0xb0] ss:$0 sps:$4 sm:$0x11]   ;;  %v560_v61 = vshll.u32 %v2102_v56, 16  ;;  %v462_v15 = vshrl.u32 %v2108_v58, 16 }
  0x2e   : > { %v625_v42 = vsel %vm613_vm0, %v623_v38, %v624_v40  ;;  %v551_v26 = vor.u32 %v550_v20, %v546_v19 }
  0x2f   : > { %764 = vrot.lane.b32.xlu1 %v1921_v3, %s1796_s20 }
  0x30   : > { %748 = vrot.lane.b32.xlu0 %v1925_v5, %s1796_s20 }
  0x33   : > { %797 = vrot.lane.b32.xlu1 %v1878_v23, %s1797_s21 }
  0x34   : > { %781 = vrot.lane.b32.xlu0 %v619_v27, %s1797_s21  ;;  %v1758_v27 = vld [vmem:[%s2583_s1 + $0x8] sm:$0xff]  }
  0x35   : > { %1652 = vmatprep.subr.bf16.mxu0 %v1758_v27  ;;  %1689 = vmatprep.subr.bf16.mxu1 %v1758_v27 }
  0x36   : > { %1653 = vmatpush3.bf16.msra.mxu0 %v1758_v27  ;;  %1692 = vmatpush3.bf16.msra.mxu1 %v1758_v27  ;;  %v555_v27 = vrot.slane %v553_v21, 1 }
  0x37   : > { %799 = vrot.lane.b32.xlu1 %v1939_v11, %s1797_s21  ;;  %1694 = vmatprep.subr.msk.bf16.mxu0 %vm1249_vm2, %v1761_v32 }
  0x38   : > { %783 = vrot.lane.b32.xlu0 %v1943_v13, %s1797_s21  ;;  %1695 = vmatprep.subr.msk.bf16.mxu1 %vm1249_vm2, %v1761_v32  ;;  %v556_v31 = vsel %vm388_vm1, %v551_v26, %v555_v27 }
  0x3a   : > { %1655 = vmatpush3.bf16.msra.mxu0 %v1251_v34  ;;  %1693 = vmatpush3.bf16.msra.mxu1 %v1251_v34 }
  0x3b   : > { %834 = vrot.lane.b32.xlu1 %v1888_v39, %s1798_s22 }
  0x3c   : > { %818 = vrot.lane.b32.xlu0 %v1894_v46, %s1798_s22 }
  0x3f   : > { %836 = vrot.lane.b32.xlu1 %v1936_v10, %s1798_s22 }
  0x40   : > { %820 = vrot.lane.b32.xlu0 %v1946_v14, %s1798_s22 }
  0x43   : > { %881 = vrot.lane.b32.xlu1 %v1921_v3, %s1799_s27 }
  0x44   : > { %865 = vrot.lane.b32.xlu0 %v1925_v5, %s1799_s27 }
  0x47   : > { %883 = vrot.lane.b32.xlu1 %v532_v33, %s1799_s27 }
  0x48   : > { %867 = vrot.lane.b32.xlu0 %v436_v35, %s1799_s27 }
  0x4b   : > { %916 = vrot.lane.b32.xlu1 %v1939_v11, %s1800_s30 }
  0x4c   : > { %900 = vrot.lane.b32.xlu0 %v1943_v13, %s1800_s30 }
  0x4f   : > { %601 = vrot.lane.b32.xlu1 %v1921_v3, %s1795_s19  ;;  %v650_v3 = vrot.slane %v2002_v43, 1 }
  0x50   : > { %585 = vrot.lane.b32.xlu0 %v1925_v5, %s1795_s19  ;;  %v651_v5 = vrot.slane %v1747_v45, 1  ;;  %v655_v45 = vsel %vm613_vm0, %v653_v36, %v654_v37  ;;  %v656_v36 = vrot.slane %v2102_v56, 1  ;;  %v657_v37 = vrot.slane %v1755_v60, 1 }
  0x52   : > { %v652_v8 = vsel %vm613_vm0, %v650_v3, %v651_v5  ;;  %v464_v3 = vshll.u32 %v2108_v58, 16 }
  0x53   : > { %918 = vrot.lane.b32.xlu1 %v649_v41, %s1800_s30 }
  0x54   : > { %902 = vrot.lane.b32.xlu0 %v625_v42, %s1800_s30  ;;  %v466_v16 = vrot.slane %v464_v3, 1  ;;  %v2164_v3 = vld [vmem:[%s1840_s16 + $0xb4] sm:$0xff]  }
  0x57   : > { %603 = vrot.lane.b32.xlu1 %v532_v33, %s1795_s19 }
  0x58   : > { %587 = vrot.lane.b32.xlu0 %v436_v35, %s1795_s19 }
  0x5b   : > { %682 = vrot.lane.b32.xlu1 %v1939_v11, %s1794_s18  ;;  %v628_v11 = vsel %vm613_vm0, %v626_v6, %v627_v7  ;;  %v558_v6 = vshrl.u32 %v2102_v56, 16  ;;  %v562_v7 = vrot.slane %v560_v61, 1 }
  0x5c   : > { %666 = vrot.lane.b32.xlu0 %v1943_v13, %s1794_s18  ;;  %v2041_v13 = vld [vmem:[%s1840_s16 + $0x3c] sm:$0xff]  }
  0x5d   : > { %v452_v18 = vshll.u32 %v2041_v13, 16  ;;  %v450_v22 = vshrl.u32 %v2041_v13, 16  ;;  %v629_v40 = vrot.slane %v2041_v13, 1  ;;  %v563_v19 = vor.u32 %v562_v7, %v558_v6 }
  0x5f   : > { %684 = vrot.lane.b32.xlu1 %v649_v41, %s1794_s18  ;;  %v454_v24 = vrot.slane %v452_v18, 1 }
  0x60   : > { %668 = vrot.lane.b32.xlu0 %v625_v42, %s1794_s18 }
  0x61   : > { %v455_v28 = vor.u32 %v454_v24, %v450_v22  ;;  %v467_v22 = vor.u32 %v466_v16, %v462_v15 }
  0x63   : > { %719 = vrot.lane.b32.xlu1 %v1936_v10, %s1793_s17 }
  0x64   : > { %703 = vrot.lane.b32.xlu0 %v1946_v14, %s1793_s17 }
  0x67   : > { %721 = vrot.lane.b32.xlu1 %v2002_v43, %s1793_s17 }
  0x68   : > { %705 = vrot.lane.b32.xlu0 %v2007_v44, %s1793_s17 }
  0x6b   : > { %766 = vrot.lane.b32.xlu1 %v532_v33, %s1796_s20  ;;  %v460_v33 = vsel %vm388_vm1, %v455_v28, %v459_v29 }
  0x6c   : > { %750 = vrot.lane.b32.xlu0 %v436_v35, %s1796_s20 }
  0x6f   : > { %768 = vrot.lane.b32.xlu1 %v544_v62, %s1796_s20 }
  0x70   : > { %752 = vrot.lane.b32.xlu0 %v448_v63, %s1796_s20 }
  0x73   : > { %801 = vrot.lane.b32.xlu1 %v649_v41, %s1797_s21  ;;  %v630_v41 = vrot.slane %v1752_v17, 1 }
  0x74   : > { %785 = vrot.lane.b32.xlu0 %v625_v42, %s1797_s21 }
  0x75   : > { %v2087_v49 = vsel %vm613_vm0, %v629_v40, %v630_v41 }
  0x77   : > { %803 = vrot.lane.b32.xlu1 %v652_v8, %s1797_s21 }
  0x78   : > { %787 = vrot.lane.b32.xlu0 %v628_v11, %s1797_s21 }
  0x7b   : > { %838 = vrot.lane.b32.xlu1 %v2002_v43, %s1798_s22 }
  0x7c   : > { %822 = vrot.lane.b32.xlu0 %v2007_v44, %s1798_s22 }
  0x7f   : > { %840 = vrot.lane.b32.xlu1 %v2036_v9, %s1798_s22 }
  0x80   : > { %824 = vrot.lane.b32.xlu0 %v2041_v13, %s1798_s22 }
  0x83   : > { %885 = vrot.lane.b32.xlu1 %v544_v62, %s1799_s27 }
  0x84   : > { %869 = vrot.lane.b32.xlu0 %v448_v63, %s1799_s27 }
  0x85   : > { %v2060_v30 = vpop.permute.xlu1 %715 }
  0x86   : > { %v2064_v32 = vpop.permute.xlu0 %699 }
  0x87   : > { %887 = vrot.lane.b32.xlu1 %v556_v31, %s1799_s27 }
  0x88   : > { %871 = vrot.lane.b32.xlu0 %v460_v33, %s1799_s27 }
  0x89   : > { %v2069_v34 = vpop.permute.xlu1 %678 }
  0x8a   : > { %v2071_v35 = vpop.permute.xlu0 %662 }
  0x8b   : > { %920 = vrot.lane.b32.xlu1 %v652_v8, %s1800_s30 }
  0x8c   : > { %904 = vrot.lane.b32.xlu0 %v628_v11, %s1800_s30 }
  0x8d   : > { %v2076_v38 = vpop.permute.xlu1 %680 }
  0x8e   : > { %v2079_v42 = vpop.permute.xlu0 %664 }
  0x8f   : > { %605 = vrot.lane.b32.xlu1 %v544_v62, %s1795_s19 }
  0x90   : > { %589 = vrot.lane.b32.xlu0 %v448_v63, %s1795_s19  ;;  %v1756_v63 = vld [vmem:[%s1840_s16 + $0x50] ss:$0 sps:$4 sm:$0x11]  }
  0x91   : > { %v2084_v47 = vpop.permute.xlu1 %583  ;;  %v469_v17 = vshll.u32 %v1756_v63, 16  ;;  %v633_v40 = vrot.slane %v1756_v63, 1 }
  0x92   : > { %v582_v50 = vpop.permute.xlu0 %581 }
  0x93   : > { %922 = vrot.lane.b32.xlu1 %v655_v45, %s1800_s30  ;;  %v471_v24 = vrot.slane %v469_v17, 1  ;;  %v934_v6 = vsel %vm932_vm3, %v1857_v4, %v582_v50 }
  0x94   : > { %906 = vrot.lane.b32.xlu0 %v2087_v49, %s1800_s30  ;;  %v967_v4 = vsel %vm965_vm4, %v934_v6, %v2071_v35  ;;  %v2193_v35 = vld [vmem:[%s1840_s16 + $0x5c] ss:$0 sps:$4 sm:$0x11]  }
  0x95   : > { %v2092_v52 = vpop.permute.xlu1 %599  ;;  %v2145_v28 = vsel %vm388_vm1, %v467_v22, %v471_v24  ;;  %v570_v22 = vshrl.u32 %v2164_v3, 16 }
  0x96   : > { %v598_v53 = vpop.permute.xlu0 %597 }
  0x97   : > { %607 = vrot.lane.b32.xlu1 %v556_v31, %s1795_s19  ;;  %v950_v41 = vsel %vm932_vm3, %v1853_v2, %v598_v53 }
  0x98   : > { %591 = vrot.lane.b32.xlu0 %v460_v33, %s1795_s19  ;;  %v983_v53 = vsel %vm965_vm4, %v950_v41, %v2069_v34  ;;  %v572_v34 = vshll.u32 %v2164_v3, 16 }
  0x99   : > { %v2096_v54 = vpop.permute.xlu1 %717  ;;  %v1016_v50 = vsel %vm998_vm6, %v983_v53, %v2060_v30  ;;  %v481_v53 = vshll.u32 %v2193_v35, 16 }
  0x9a   : > { %v2098_v55 = vpop.permute.xlu0 %701 }
  0x9b   : > { %686 = vrot.lane.b32.xlu1 %v652_v8, %s1794_s18  ;;  %v565_v8 = vshll.u32 %v1755_v60, 16  ;;  %v2161_v60 = vsel %vm613_vm0, %v656_v36, %v657_v37  ;;  %v574_v36 = vrot.slane %v572_v34, 1 }
  0x9c   : > { %670 = vrot.lane.b32.xlu0 %v628_v11, %s1794_s18 }
  0x9d   : > { %v2105_v57 = vpop.permute.xlu1 %762  ;;  %v567_v20 = vrot.slane %v565_v8, 1 }
  0x9e   : > { %v2110_v59 = vpop.permute.xlu0 %746  ;;  %v1049_v16 = vsel %vm1031_vm5, %v1016_v50, %v2105_v57 }
  0x9f   : > { %688 = vrot.lane.b32.xlu1 %v655_v45, %s1794_s18  ;;  %v2141_v26 = vsel %vm388_vm1, %v563_v19, %v567_v20  ;;  %v1000_v19 = vsel %vm998_vm6, %v967_v4, %v2064_v32  ;;  %v952_v32 = vsel %vm932_vm3, %v1843_v0, %v2092_v52  ;;  %v936_v0 = vsel %vm932_vm3, %v1846_v1, %v2084_v47 }
  0xa0   : > { %672 = vrot.lane.b32.xlu0 %v2087_v49, %s1794_s18  ;;  %v1033_v57 = vsel %vm1031_vm5, %v1000_v19, %v2110_v59  ;;  %v575_v4 = vor.u32 %v574_v36, %v570_v22  ;;  %v969_v47 = vsel %vm965_vm4, %v936_v0, %v2079_v42 }
  0xa1   : > { %v2117_v62 = vpop.permute.xlu1 %764 }
  0xa2   : > { %v2121_v5 = vpop.permute.xlu0 %748 }
  0xa3   : > { %723 = vrot.lane.b32.xlu1 %v2036_v9, %s1793_s17 }
  0xa4   : > { %707 = vrot.lane.b32.xlu0 %v2041_v13, %s1793_s17 }
  0xa5   : > { %v798_v11 = vpop.permute.xlu1 %797 }
  0xa6   : > { %v2129_v18 = vpop.permute.xlu0 %781  ;;  %v1082_v20 = vsel %vm1064_vm7, %v1049_v16, %v798_v11  ;;  %v483_v16 = vrot.slane %v481_v53, 1  ;;  %v1764_v53 = vld [vmem:[%s1840_s16 + $0xc0] sm:$0xff]  }
  0xa7   : > { %725 = vrot.lane.b32.xlu1 %v2102_v56, %s1793_s17  ;;  %v1066_v11 = vsel %vm1064_vm7, %v1033_v57, %v2129_v18 }
  0xa8   : > { %709 = vrot.lane.b32.xlu0 %v2108_v58, %s1793_s17 }
  0xa9   : > { %v2135_v21 = vpop.permute.xlu1 %799 }
  0xaa   : > { %v2137_v25 = vpop.permute.xlu0 %783 }
  0xab   : > { %770 = vrot.lane.b32.xlu1 %v556_v31, %s1796_s20 }
  0xac   : > { %754 = vrot.lane.b32.xlu0 %v460_v33, %s1796_s20  ;;  %v632_v33 = vrot.slane %v2108_v58, 1 }
  0xad   : > { %v835_v27 = vpop.permute.xlu1 %834 }
  0xae   : > { %v819_v29 = vpop.permute.xlu0 %818  ;;  %v2173_v7 = vsel %vm613_vm0, %v632_v33, %v633_v40  ;;  %v1115_v24 = vsel %vm1097_vm8, %v1082_v20, %v835_v27 }
  0xaf   : > { %772 = vrot.lane.b32.xlu1 %v2141_v26, %s1796_s20  ;;  %v1099_v27 = vsel %vm1097_vm8, %v1066_v11, %v819_v29  ;;  %v985_v29 = vsel %vm965_vm4, %v952_v32, %v2076_v38 }
  0xb0   : > { %756 = vrot.lane.b32.xlu0 %v2145_v28, %s1796_s20  ;;  %v1018_v50 = vsel %vm998_vm6, %v985_v29, %v2096_v54  ;;  %v737_v29 = vshll.u32 %v1764_v53, 16 }
  0xb1   : > { %v2152_v31 = vpop.permute.xlu1 %836  ;;  %v1051_v38 = vsel %vm1031_vm5, %v1018_v50, %v2117_v62 }
  0xb2   : > { %v2157_v61 = vpop.permute.xlu0 %820  ;;  %v1084_v54 = vsel %vm1064_vm7, %v1051_v38, %v2135_v21 }
  0xb3   : > { %805 = vrot.lane.b32.xlu1 %v655_v45, %s1797_s21  ;;  %v2176_v45 = vld [vmem:[%s1840_s16 + $0x54] sm:$0xff]   ;;  %v1117_v42 = vsel %vm1097_vm8, %v1084_v54, %v2152_v31 }
  0xb4   : > { %789 = vrot.lane.b32.xlu0 %v2087_v49, %s1797_s21  ;;  %v2183_v49 = vld [vmem:[%s1840_s16 + $0xbc] ss:$0 sps:$4 sm:$0x11]   ;;  %v476_v17 = vshll.u32 %v2176_v45, 16  ;;  %v474_v59 = vshrl.u32 %v2176_v45, 16  ;;  %v635_v11 = vrot.slane %v2176_v45, 1 }
  0xb5   : > { %v882_v63 = vpop.permute.xlu1 %881  ;;  %v577_v37 = vshll.u32 %v2183_v49, 16 }
  0xb6   : > { %v866_v8 = vpop.permute.xlu0 %865  ;;  %v1148_v33 = vsel %vm1130_vm9, %v1115_v24, %v882_v63  ;;  %v478_v6 = vrot.slane %v476_v17, 1  ;;  %v1002_v17 = vsel %vm998_vm6, %v969_v47, %v2098_v55 }
  0xb7   : > { %807 = vrot.lane.b32.xlu1 %v2161_v60, %s1797_s21  ;;  %v1132_v52 = vsel %vm1130_vm9, %v1099_v27, %v866_v8  ;;  %v579_v34 = vrot.slane %v577_v37, 1  ;;  %v1035_v20 = vsel %vm1031_vm5, %v1002_v17, %v2121_v5  ;;  %v660_v37 = vrot.slane %v2183_v49, 1 }
  0xb8   : > { %791 = vrot.lane.b32.xlu0 %v2173_v7, %s1797_s21  ;;  %v479_v8 = vor.u32 %v478_v6, %v474_v59  ;;  %v1068_v22 = vsel %vm1064_vm7, %v1035_v20, %v2137_v25 }
  0xb9   : > { %v884_v15 = vpop.permute.xlu1 %883  ;;  %v580_v62 = vsel %vm388_vm1, %v575_v4, %v579_v34  ;;  %v1101_v57 = vsel %vm1097_vm8, %v1068_v22, %v2157_v61  ;;  %v739_v34 = vrot.slane %v737_v29, 1  ;;  %v778_v22 = vrot.slane %v1764_v53, 1 }
  0xba   : > { %v868_v30 = vpop.permute.xlu0 %867  ;;  %v1150_v55 = vsel %vm1130_vm9, %v1117_v42, %v884_v15  ;;  %v484_v5 = vsel %vm388_vm1, %v479_v8, %v483_v16 }
  0xbb   : > { %842 = vrot.lane.b32.xlu1 %v2102_v56, %s1798_s22  ;;  %v1134_v31 = vsel %vm1130_vm9, %v1101_v57, %v868_v30  ;;  %v659_v30 = vrot.slane %v2164_v3, 1 }
  0xbc   : > { %826 = vrot.lane.b32.xlu0 %v2108_v58, %s1798_s22 }
  0xbd   : > { %v917_v40 = vpop.permute.xlu1 %916  ;;  %v661_v59 = vsel %vm613_vm0, %v659_v30, %v660_v37  ;;  %v2343_v30 = vld [vmem:[%s1840_s16 + $0xd4] ss:$0 sps:$4 sm:$0x11]  }
  0xbe   : > { %v1181_v41 = vsel %vm1163_vm10, %v1148_v33, %v917_v40  ;;  %v901_v18 = vpop.permute.xlu0 %900  ;;  %v636_v33 = vrot.slane %v2193_v35, 1 }
  0xbf   : > { %844 = vrot.lane.b32.xlu1 %v2164_v3, %s1798_s22  ;;  %1672 = vmatprep.mubr.msk.bf16.mxu1 %vm1216_vm11, %v1181_v41  ;;  %v1165_v63 = vsel %vm1163_vm10, %v1132_v52, %v901_v18  ;;  %v1765_v18 = vld [vmem:[%s1840_s16 + $0xc8] ss:$0 sps:$4 sm:$0x11]  }
  0xc0   : > { %828 = vrot.lane.b32.xlu0 %v2176_v45, %s1798_s22  ;;  %1656 = vmatprep.mubr.msk.bf16.mxu0 %vm1216_vm11, %v1165_v63  ;;  %v637_v27 = vsel %vm613_vm0, %v635_v11, %v636_v33  ;;  %v742_v50 = vshll.u32 %v1765_v18, 16 }
  0xc1   : > { %v2233_v1 = vpop.permute.xlu1 %601 }
  0xc2   : > { %v2243_v19 = vpop.permute.xlu0 %585  ;;  %v744_v8 = vrot.slane %v742_v50, 1 }
  0xc3   : > { %889 = vrot.lane.b32.xlu1 %v2141_v26, %s1799_s27  ;;  %v938_v11 = vsel %vm932_vm3, %v1894_v46, %v2243_v19 }
  0xc4   : > { %873 = vrot.lane.b32.xlu0 %v2145_v28, %s1799_s27 }
  0xc5   : > { %v919_v21 = vpop.permute.xlu1 %918 }
  0xc6   : > { %v1183_v24 = vsel %vm1163_vm10, %v1150_v55, %v919_v21  ;;  %v903_v36 = vpop.permute.xlu0 %902  ;;  %v779_v55 = vrot.slane %v1765_v18, 1 }
  0xc7   : > { %891 = vrot.lane.b32.xlu1 %v580_v62, %s1799_s27  ;;  %1673 = vmatmul.mubr.msk.bf16.vlgmr.msra.gmra.mrb[0].mxu1 %vm1216_vm11, %v1183_v24  ;;  %v1167_v25 = vsel %vm1163_vm10, %v1134_v31, %v903_v36  ;;  %v2333_v24 = vld [vmem:[%s1840_s16 + $0xcc] sm:$0xff]   ;;  %v954_v31 = vsel %vm932_vm3, %v1888_v39, %v2233_v1 }
  0xc8   : > { %875 = vrot.lane.b32.xlu0 %v484_v5, %s1799_s27  ;;  %1657 = vmatmul.mubr.msk.bf16.vlgmr.msra.gmra.mrb[0].mxu0 %vm1216_vm11, %v1167_v25  ;;  %v856_v37 = vshll.u32 %v2333_v24, 16  ;;  %v854_v46 = vshrl.u32 %v2333_v24, 16 }
  0xc9   : > { %v2267_v15 = vpop.permute.xlu1 %603 }
  0xca   : > { %v2269_v61 = vpop.permute.xlu0 %587  ;;  %v858_v29 = vrot.slane %v856_v37, 1 }
  0xcb   : > { %924 = vrot.lane.b32.xlu1 %v2161_v60, %s1800_s30 }
  0xcc   : > { %908 = vrot.lane.b32.xlu0 %v2173_v7, %s1800_s30 }
  0xcd   : > { %v683_v32 = vpop.permute.xlu1 %682 }
  0xce   : > { %v2279_v40 = vpop.permute.xlu0 %666  ;;  %v987_v25 = vsel %vm965_vm4, %v954_v31, %v683_v32 }
  0xcf   : > { %609 = vrot.lane.b32.xlu1 %v2141_v26, %s1795_s19  ;;  %v971_v1 = vsel %vm965_vm4, %v938_v11, %v2279_v40 }
  0xd0   : > { %593 = vrot.lane.b32.xlu0 %v2145_v28, %s1795_s19 }
  0xd1   : > { %v2286_v49 = vpop.permute.xlu1 %684 }
  0xd2   : > { %v2289_v41 = vpop.permute.xlu0 %668 }
  0xd3   : > { %926 = vrot.lane.b32.xlu1 %v661_v59, %s1800_s30 }
  0xd4   : > { %910 = vrot.lane.b32.xlu0 %v637_v27, %s1800_s30 }
  0xd5   : > { %v720_v35 = vpop.permute.xlu1 %719 }
  0xd6   : > { %v704_v6 = vpop.permute.xlu0 %703  ;;  %v1020_v33 = vsel %vm998_vm6, %v987_v25, %v720_v35  ;;  %v898_v25 = vrot.slane %v2343_v30, 1 }
  0xd7   : > { %611 = vrot.lane.b32.xlu1 %v580_v62, %s1795_s19  ;;  %v1004_v32 = vsel %vm998_vm6, %v971_v1, %v704_v6 }
  0xd8   : > { %595 = vrot.lane.b32.xlu0 %v484_v5, %s1795_s19 }
  0xd9   : > { %v2295_v26 = vpop.permute.xlu1 %721 }
  0xda   : > { %v2297_v28 = vpop.permute.xlu0 %705 }
  0xdb   : > { %690 = vrot.lane.b32.xlu1 %v2161_v60, %s1794_s18  ;;  %v735_v60 = vshrl.u32 %v1764_v53, 16 }
  0xdc   : > { %674 = vrot.lane.b32.xlu0 %v2173_v7, %s1794_s18 }
  0xdd   : > { %v767_v0 = vpop.permute.xlu1 %766  ;;  %v740_v38 = vor.u32 %v739_v34, %v735_v60  ;;  %v861_v60 = vshll.u32 %v2343_v30, 16 }
  0xde   : > { %v751_v52 = vpop.permute.xlu0 %750 }
  0xdf   : > { %692 = vrot.lane.b32.xlu1 %v661_v59, %s1794_s18  ;;  %v745_v54 = vsel %vm388_vm1, %v740_v38, %v744_v8  ;;  %v1037_v19 = vsel %vm1031_vm5, %v1004_v32, %v751_v52  ;;  %v956_v52 = vsel %vm932_vm3, %v1936_v10, %v2267_v15  ;;  %v859_v38 = vor.u32 %v858_v29, %v854_v46  ;;  %v1768_v15 = vld [vmem:[%s1840_s16 + $0x6c] sm:$0xff]  }
  0xe0   : > { %676 = vrot.lane.b32.xlu0 %v637_v27, %s1794_s18  ;;  %v863_v8 = vrot.slane %v861_v60, 1 }
  0xe1   : > { %v2307_v63 = vpop.permute.xlu1 %768 }
  0xe2   : > { %v2309_v4 = vpop.permute.xlu0 %752  ;;  %v864_v31 = vsel %vm388_vm1, %v859_v38, %v863_v8 }
  0xe3   : > { %727 = vrot.lane.b32.xlu1 %v2164_v3, %s1793_s17 }
  0xe4   : > { %711 = vrot.lane.b32.xlu0 %v2176_v45, %s1793_s17 }
  0xe5   : > { %v802_v7 = vpop.permute.xlu1 %801 }
  0xe6   : > { %v786_v47 = vpop.permute.xlu0 %785 }
  0xe7   : > { %729 = vrot.lane.b32.xlu1 %v1764_v53, %s1793_s17  ;;  %v1070_v40 = vsel %vm1064_vm7, %v1037_v19, %v786_v47 }
  0xe8   : > { %713 = vrot.lane.b32.xlu0 %v1853_v2, %s1793_s17 }
  0xe9   : > { %v2318_v16 = vpop.permute.xlu1 %803 }
  0xea   : > { %v2320_v17 = vpop.permute.xlu0 %787 }
  0xeb   : > { %774 = vrot.lane.b32.xlu1 %v580_v62, %s1796_s20  ;;  %v2330_v62 = vsel %vm613_vm0, %v778_v22, %v779_v55 }
  0xec   : > { %758 = vrot.lane.b32.xlu0 %v484_v5, %s1796_s20 }
  0xed   : > { %v839_v20 = vpop.permute.xlu1 %838 }
  0xee   : > { %v823_v42 = vpop.permute.xlu0 %822 }
  0xef   : > { %776 = vrot.lane.b32.xlu1 %v745_v54, %s1796_s20 }
  0xf0   : > { %760 = vrot.lane.b32.xlu0 %v1904_v51, %s1796_s20 }
  0xf1   : > { %v841_v21 = vpop.permute.xlu1 %840 }
  0xf2   : > { %v825_v57 = vpop.permute.xlu0 %824 }
  0xf3   : > { %809 = vrot.lane.b32.xlu1 %v661_v59, %s1797_s21  ;;  %v1053_v59 = vsel %vm1031_vm5, %v1020_v33, %v767_v0 }
  0xf4   : > { %793 = vrot.lane.b32.xlu0 %v637_v27, %s1797_s21  ;;  %v1086_v27 = vsel %vm1064_vm7, %v1053_v59, %v802_v7 }
  0xf5   : > { %v886_v5 = vpop.permute.xlu1 %885  ;;  %v1119_v35 = vsel %vm1097_vm8, %v1086_v27, %v839_v20  ;;  %v940_v20 = vsel %vm932_vm3, %v1946_v14, %v2269_v61 }
  0xf6   : > { %v870_v36 = vpop.permute.xlu0 %869  ;;  %v1152_v0 = vsel %vm1130_vm9, %v1119_v35, %v886_v5 }
  0xf7   : > { %811 = vrot.lane.b32.xlu1 %v2330_v62, %s1797_s21 }
  0xf8   : > { %795 = vrot.lane.b32.xlu0 %v1866_v12, %s1797_s21 }
  0xf9   : > { %v888_v39 = vpop.permute.xlu1 %887 }
  0xfa   : > { %v872_v18 = vpop.permute.xlu0 %871 }
  0xfb   : > { %846 = vrot.lane.b32.xlu1 %v1764_v53, %s1798_s22  ;;  %v1103_v53 = vsel %vm1097_vm8, %v1070_v40, %v823_v42 }
  0xfc   : > { %830 = vrot.lane.b32.xlu0 %v1853_v2, %s1798_s22  ;;  %v1136_v50 = vsel %vm1130_vm9, %v1103_v53, %v870_v36  ;;  %v989_v2 = vsel %vm965_vm4, %v956_v52, %v2286_v49  ;;  %v973_v49 = vsel %vm965_vm4, %v940_v20, %v2289_v41 }
  0xfd   : > { %v921_v6 = vpop.permute.xlu1 %920  ;;  %v1022_v10 = vsel %vm998_vm6, %v989_v2, %v2295_v26  ;;  %v1006_v55 = vsel %vm998_vm6, %v973_v49, %v2297_v28 }
  0xfe   : > { %v1185_v34 = vsel %vm1163_vm10, %v1152_v0, %v921_v6  ;;  %v905_v7 = vpop.permute.xlu0 %904  ;;  %v1055_v22 = vsel %vm1031_vm5, %v1022_v10, %v2307_v63  ;;  %v1039_v26 = vsel %vm1031_vm5, %v1006_v55, %v2309_v4 }
  0xff   : > { %848 = vrot.lane.b32.xlu1 %v2333_v24, %s1798_s22  ;;  %1676 = vmatprep.mubr.msk.bf16.mxu1 %vm1216_vm11, %v1185_v34  ;;  %v1169_v47 = vsel %vm1163_vm10, %v1136_v50, %v905_v7  ;;  %v1088_v14 = vsel %vm1064_vm7, %v1055_v22, %v2318_v16  ;;  %v1072_v41 = vsel %vm1064_vm7, %v1039_v26, %v2320_v17  ;;  %v897_v17 = vrot.slane %v2333_v24, 1 }
 0x100   : > { %832 = vrot.lane.b32.xlu0 %v1768_v15, %s1798_s22  ;;  %1660 = vmatprep.mubr.msk.bf16.mxu0 %vm1216_vm11, %v1169_v47  ;;  %v1121_v5 = vsel %vm1097_vm8, %v1088_v14, %v841_v21  ;;  %v1105_v16 = vsel %vm1097_vm8, %v1072_v41, %v825_v57 }
 0x101   : > { %v606_v42 = vpop.permute.xlu1 %605  ;;  %v1154_v63 = vsel %vm1130_vm9, %v1121_v5, %v888_v39  ;;  %v1138_v36 = vsel %vm1130_vm9, %v1105_v16, %v872_v18  ;;  %v899_v37 = vsel %vm613_vm0, %v897_v17, %v898_v25 }
 0x102   : > { %v590_v61 = vpop.permute.xlu0 %589 }
 0x103   : > { %893 = vrot.lane.b32.xlu1 %v745_v54, %s1799_s27  ;;  %v942_v52 = vsel %vm932_vm3, %v2007_v44, %v590_v61 }
 0x104   : > { %877 = vrot.lane.b32.xlu0 %v1904_v51, %s1799_s27 }
 0x105   : > { %v923_v28 = vpop.permute.xlu1 %922 }
 0x106   : > { %v1187_v54 = vsel %vm1163_vm10, %v1154_v63, %v923_v28  ;;  %v907_v4 = vpop.permute.xlu0 %906 }
 0x107   : > { %895 = vrot.lane.b32.xlu1 %v864_v31, %s1799_s27  ;;  %1677 = vmatmul.mubr.msk.bf16.gmra.mrb[4].mxu1 %vm1216_vm11, %v1187_v54  ;;  %v1171_v21 = vsel %vm1163_vm10, %v1138_v36, %v907_v4 }
 0x108   : > { %879 = vrot.lane.b32.xlu0 %v1899_v48, %s1799_s27  ;;  %1661 = vmatmul.mubr.msk.bf16.gmra.mrb[4].mxu0 %vm1216_vm11, %v1171_v21 }
 0x109   : > { %v608_v51 = vpop.permute.xlu1 %607 }
 0x10a   : > { %v592_v57 = vpop.permute.xlu0 %591  ;;  %v960_v55 = vsel %vm932_vm3, %v2036_v9, %v608_v51 }
 0x10b   : > { %928 = vrot.lane.b32.xlu1 %v2330_v62, %s1800_s30  ;;  %v944_v31 = vsel %vm932_vm3, %v2041_v13, %v592_v57 }
 0x10c   : > { %912 = vrot.lane.b32.xlu0 %v1866_v12, %s1800_s30 }
 0x10d   : > { %v687_v11 = vpop.permute.xlu1 %686 }
 0x10e   : > { %v671_v33 = vpop.permute.xlu0 %670 }
 0x10f   : > { %930 = vrot.lane.b32.xlu1 %v899_v37, %s1800_s30  ;;  %v975_v2 = vsel %vm965_vm4, %v942_v52, %v671_v33 }
 0x110   : > { %914 = vrot.lane.b32.xlu0 %v1878_v23, %s1800_s30  ;;  %v958_v23 = vsel %vm932_vm3, %v2002_v43, %v606_v42 }
 0x111   : > { %v689_v48 = vpop.permute.xlu1 %688  ;;  %v991_v34 = vsel %vm965_vm4, %v958_v23, %v687_v11 }
 0x112   : > { %v673_v24 = vpop.permute.xlu0 %672  ;;  %v993_v26 = vsel %vm965_vm4, %v960_v55, %v689_v48 }
 0x113   : > { %v977_v28 = vsel %vm965_vm4, %v944_v31, %v673_v24 }
 0x115   : > { %v724_v30 = vpop.permute.xlu1 %723 }
 0x116   : > { %v708_v39 = vpop.permute.xlu0 %707  ;;  %v1024_v50 = vsel %vm998_vm6, %v991_v34, %v724_v30 }
 0x117   : > { %v1008_v38 = vsel %vm998_vm6, %v975_v2, %v708_v39 }
 0x119   : > { %v726_v1 = vpop.permute.xlu1 %725 }
 0x11a   : > { %v710_v59 = vpop.permute.xlu0 %709  ;;  %v1026_v41 = vsel %vm998_vm6, %v993_v26, %v726_v1 }
 0x11b   : > { %v1010_v16 = vsel %vm998_vm6, %v977_v28, %v710_v59 }
 0x11d   : > { %v771_v32 = vpop.permute.xlu1 %770 }
 0x11e   : > { %v755_v62 = vpop.permute.xlu0 %754  ;;  %v1057_v47 = vsel %vm1031_vm5, %v1024_v50, %v771_v32 }
 0x11f   : > { %v1041_v43 = vsel %vm1031_vm5, %v1008_v38, %v755_v62 }
 0x121   : > { %v773_v27 = vpop.permute.xlu1 %772 }
 0x122   : > { %v757_v18 = vpop.permute.xlu0 %756  ;;  %v1059_v9 = vsel %vm1031_vm5, %v1026_v41, %v773_v27 }
 0x123   : > { %v1043_v4 = vsel %vm1031_vm5, %v1010_v16, %v757_v18 }
 0x125   : > { %v806_v46 = vpop.permute.xlu1 %805 }
 0x126   : > { %v790_v19 = vpop.permute.xlu0 %789  ;;  %v1090_v8 = vsel %vm1064_vm7, %v1057_v47, %v806_v46 }
 0x127   : > { %v1074_v15 = vsel %vm1064_vm7, %v1041_v43, %v790_v19 }
 0x129   : > { %v808_v12 = vpop.permute.xlu1 %807 }
 0x12a   : > { %v792_v35 = vpop.permute.xlu0 %791  ;;  %v1092_v54 = vsel %vm1064_vm7, %v1059_v9, %v808_v12 }
 0x12b   : > { %v1076_v13 = vsel %vm1064_vm7, %v1043_v4, %v792_v35 }
 0x12d   : > { %v843_v29 = vpop.permute.xlu1 %842 }
 0x12e   : > { %v827_v60 = vpop.permute.xlu0 %826  ;;  %v1123_v10 = vsel %vm1097_vm8, %v1090_v8, %v843_v29 }
 0x12f   : > { %v1107_v49 = vsel %vm1097_vm8, %v1074_v15, %v827_v60 }
 0x131   : > { %v845_v40 = vpop.permute.xlu1 %844 }
 0x132   : > { %v829_v0 = vpop.permute.xlu0 %828  ;;  %v1125_v21 = vsel %vm1097_vm8, %v1092_v54, %v845_v40 }
 0x133   : > { %v1109_v51 = vsel %vm1097_vm8, %v1076_v13, %v829_v0 }
 0x135   : > { %v890_v6 = vpop.permute.xlu1 %889 }
 0x136   : > { %v874_v53 = vpop.permute.xlu0 %873  ;;  %v1156_v44 = vsel %vm1130_vm9, %v1123_v10, %v890_v6 }
 0x137   : > { %v1140_v14 = vsel %vm1130_vm9, %v1107_v49, %v874_v53 }
 0x139   : > { %v892_v7 = vpop.permute.xlu1 %891 }
 0x13a   : > { %v876_v20 = vpop.permute.xlu0 %875  ;;  %v1158_v17 = vsel %vm1130_vm9, %v1125_v21, %v892_v7 }
 0x13b   : > { %v1142_v37 = vsel %vm1130_vm9, %v1109_v51, %v876_v20 }
 0x13d   : > { %v925_v42 = vpop.permute.xlu1 %924 }
 0x13e   : > { %v1189_v22 = vsel %vm1163_vm10, %v1156_v44, %v925_v42  ;;  %v909_v61 = vpop.permute.xlu0 %908 }
 0x13f   : > { %1680 = vmatprep.mubr.msk.bf16.mxu1 %vm1216_vm11, %v1189_v22  ;;  %v1173_v5 = vsel %vm1163_vm10, %v1140_v14, %v909_v61 }
 0x140   : > { %1664 = vmatprep.mubr.msk.bf16.mxu0 %vm1216_vm11, %v1173_v5 }
 0x141   : > { %v610_v63 = vpop.permute.xlu1 %609 }
 0x142   : > { %v594_v36 = vpop.permute.xlu0 %593  ;;  %v962_v50 = vsel %vm932_vm3, %v2102_v56, %v610_v63 }
 0x143   : > { %v946_v47 = vsel %vm932_vm3, %v2108_v58, %v594_v36 }
 0x145   : > { %v927_v25 = vpop.permute.xlu1 %926 }
 0x146   : > { %v1191_v57 = vsel %vm1163_vm10, %v1158_v17, %v927_v25  ;;  %v911_v11 = vpop.permute.xlu0 %910 }
 0x147   : > { %1681 = vmatmul.mubr.msk.bf16.gmra.mrb[8].mxu1 %vm1216_vm11, %v1191_v57  ;;  %v1175_v33 = vsel %vm1163_vm10, %v1142_v37, %v911_v11 }
 0x148   : > { %1665 = vmatmul.mubr.msk.bf16.gmra.mrb[8].mxu0 %vm1216_vm11, %v1175_v33 }
 0x149   : > { %v612_v48 = vpop.permute.xlu1 %611 }
 0x14a   : > { %v596_v24 = vpop.permute.xlu0 %595  ;;  %v964_v10 = vsel %vm932_vm3, %v2164_v3, %v612_v48 }
 0x14b   : > { %v948_v22 = vsel %vm932_vm3, %v2176_v45, %v596_v24 }
 0x14d   : > { %v691_v30 = vpop.permute.xlu1 %690 }
 0x14e   : > { %v675_v39 = vpop.permute.xlu0 %674  ;;  %v995_v2 = vsel %vm965_vm4, %v962_v50, %v691_v30 }
 0x14f   : > { %v979_v20 = vsel %vm965_vm4, %v946_v47, %v675_v39 }
 0x151   : > { %v693_v1 = vpop.permute.xlu1 %692 }
 0x152   : > { %v677_v59 = vpop.permute.xlu0 %676  ;;  %v997_v42 = vsel %vm965_vm4, %v964_v10, %v693_v1 }
 0x153   : > { %v981_v26 = vsel %vm965_vm4, %v948_v22, %v677_v59 }
 0x155   : > { %v728_v32 = vpop.permute.xlu1 %727 }
 0x156   : > { %v712_v62 = vpop.permute.xlu0 %711  ;;  %v1028_v38 = vsel %vm998_vm6, %v995_v2, %v728_v32 }
 0x157   : > { %v1012_v15 = vsel %vm998_vm6, %v979_v20, %v712_v62 }
 0x159   : > { %v730_v27 = vpop.permute.xlu1 %729 }
 0x15a   : > { %v714_v18 = vpop.permute.xlu0 %713  ;;  %v1030_v55 = vsel %vm998_vm6, %v997_v42, %v730_v27 }
 0x15b   : > { %v1014_v63 = vsel %vm998_vm6, %v981_v26, %v714_v18 }
 0x15d   : > { %v775_v46 = vpop.permute.xlu1 %774 }
 0x15e   : > { %v759_v19 = vpop.permute.xlu0 %758  ;;  %v1061_v43 = vsel %vm1031_vm5, %v1028_v38, %v775_v46 }
 0x15f   : > { %v1045_v49 = vsel %vm1031_vm5, %v1012_v15, %v759_v19 }
 0x161   : > { %v777_v12 = vpop.permute.xlu1 %776 }
 0x162   : > { %v761_v35 = vpop.permute.xlu0 %760  ;;  %v1063_v5 = vsel %vm1031_vm5, %v1030_v55, %v777_v12 }
 0x163   : > { %v1047_v16 = vsel %vm1031_vm5, %v1014_v63, %v761_v35 }
 0x165   : > { %v810_v29 = vpop.permute.xlu1 %809 }
 0x166   : > { %v794_v60 = vpop.permute.xlu0 %793  ;;  %v1094_v56 = vsel %vm1064_vm7, %v1061_v43, %v810_v29 }
 0x167   : > { %v1078_v14 = vsel %vm1064_vm7, %v1045_v49, %v794_v60 }
 0x169   : > { %v812_v40 = vpop.permute.xlu1 %811 }
 0x16a   : > { %v796_v0 = vpop.permute.xlu0 %795  ;;  %v1096_v28 = vsel %vm1064_vm7, %v1063_v5, %v812_v40 }
 0x16b   : > { %v1080_v4 = vsel %vm1064_vm7, %v1047_v16, %v796_v0 }
 0x16d   : > { %v847_v6 = vpop.permute.xlu1 %846 }
 0x16e   : > { %v831_v23 = vpop.permute.xlu0 %830  ;;  %v1127_v58 = vsel %vm1097_vm8, %v1094_v56, %v847_v6 }
 0x16f   : > { %v1111_v31 = vsel %vm1097_vm8, %v1078_v14, %v831_v23 }
 0x171   : > { %v849_v53 = vpop.permute.xlu1 %848 }
 0x172   : > { %v833_v34 = vpop.permute.xlu0 %832  ;;  %v1129_v54 = vsel %vm1097_vm8, %v1096_v28, %v849_v53 }
 0x173   : > { %v1113_v17 = vsel %vm1097_vm8, %v1080_v4, %v833_v34 }
 0x175   : > { %v894_v52 = vpop.permute.xlu1 %893 }
 0x176   : > { %v878_v7 = vpop.permute.xlu0 %877  ;;  %v1160_v3 = vsel %vm1130_vm9, %v1127_v58, %v894_v52 }
 0x177   : > { %v1144_v45 = vsel %vm1130_vm9, %v1111_v31, %v878_v7 }
 0x179   : > { %v896_v8 = vpop.permute.xlu1 %895 }
 0x17a   : > { %v880_v44 = vpop.permute.xlu0 %879  ;;  %v1162_v21 = vsel %vm1130_vm9, %v1129_v54, %v896_v8 }
 0x17b   : > { %v1146_v51 = vsel %vm1130_vm9, %v1113_v17, %v880_v44 }
 0x17d   : > { %v929_v61 = vpop.permute.xlu1 %928 }
 0x17e   : > { %v1193_v41 = vsel %vm1163_vm10, %v1160_v3, %v929_v61  ;;  %v913_v9 = vpop.permute.xlu0 %912 }
 0x17f   : > { %1684 = vmatprep.mubr.msk.bf16.mxu1 %vm1216_vm11, %v1193_v41  ;;  %v1177_v36 = vsel %vm1163_vm10, %v1144_v45, %v913_v9 }
 0x180   : > { %1668 = vmatprep.mubr.msk.bf16.mxu0 %vm1216_vm11, %v1177_v36 }
 0x181   : > { %v931_v13 = vpop.permute.xlu1 %930 }
 0x182   : > { %v1195_v25 = vsel %vm1163_vm10, %v1162_v21, %v931_v13  ;;  %v915_v57 = vpop.permute.xlu0 %914 }
 0x183   : > { %1685 = vmatmul.mubr.msk.bf16.gmra.mrb[12].mxu1 %vm1216_vm11, %v1195_v25  ;;  %v1179_v37 = vsel %vm1163_vm10, %v1146_v51, %v915_v57 }
 0x184   : > { %1669 = vmatmul.mubr.msk.bf16.gmra.mrb[12].mxu0 %vm1216_vm11, %v1179_v37 }
 0x19a   : > { %v1674_v11 = vpop.f32.mrb[0].mxu1 }
 0x19b   : > { %1433 = vst.msk [vmem:[%s2507_s6 + $0x90] sm:$0xff] %vm1414_vm12, %v1674_v11  ;;  %v1351_v33 = vpop.f32.mrb[1].mxu1  ;;  %v1658_v48 = vpop.f32.mrb[0].mxu0 }
 0x19c   : > { %1431 = vst.msk [vmem:[%s2507_s6 + $0x80] sm:$0xff] %vm1414_vm12, %v1351_v33  ;;  %v1675_v24 = vpop.f32.mrb[2].mxu1  ;;  %1417 = vst.msk [vmem:[%s2507_s6 + $0x10] sm:$0xff] %vm1414_vm12, %v1658_v48  ;;  %v1287_v30 = vpop.f32.mrb[1].mxu0 }
 0x19d   : > { %1434 = vst.msk [vmem:[%s2507_s6 + $0x98] sm:$0xff] %vm1414_vm12, %v1675_v24  ;;  %v1354_v39 = vpop.f32.mrb[3].mxu1  ;;  %1415 = vst.msk [vmem:[%s2507_s6] sm:$0xff] %vm1414_vm12, %v1287_v30  ;;  %v1659_v1 = vpop.f32.mrb[2].mxu0 }
 0x19e   : > { %1432 = vst.msk [vmem:[%s2507_s6 + $0x88] sm:$0xff] %vm1414_vm12, %v1354_v39  ;;  %1418 = vst.msk [vmem:[%s2507_s6 + $0x18] sm:$0xff] %vm1414_vm12, %v1659_v1  ;;  %v1290_v59 = vpop.f32.mrb[3].mxu0 }
 0x19f   : > { %1416 = vst.msk [vmem:[%s2507_s6 + $0x8] sm:$0xff] %vm1414_vm12, %v1290_v59 }
 0x1da   : > { %v1678_v32 = vpop.f32.mrb[4].mxu1 }
 0x1db   : > { %1437 = vst.msk [vmem:[%s2507_s6 + $0xb0] sm:$0xff] %vm1414_vm12, %v1678_v32  ;;  %v1367_v62 = vpop.f32.mrb[5].mxu1  ;;  %v1662_v27 = vpop.f32.mrb[4].mxu0 }
 0x1dc   : > { %1435 = vst.msk [vmem:[%s2507_s6 + $0xa0] sm:$0xff] %vm1414_vm12, %v1367_v62  ;;  %v1679_v18 = vpop.f32.mrb[6].mxu1  ;;  %1421 = vst.msk [vmem:[%s2507_s6 + $0x30] sm:$0xff] %vm1414_vm12, %v1662_v27  ;;  %v1303_v46 = vpop.f32.mrb[5].mxu0 }
 0x1dd   : > { %1438 = vst.msk [vmem:[%s2507_s6 + $0xb8] sm:$0xff] %vm1414_vm12, %v1679_v18  ;;  %v1370_v19 = vpop.f32.mrb[7].mxu1  ;;  %1419 = vst.msk [vmem:[%s2507_s6 + $0x20] sm:$0xff] %vm1414_vm12, %v1303_v46  ;;  %v1663_v12 = vpop.f32.mrb[6].mxu0 }
 0x1de   : > { %1436 = vst.msk [vmem:[%s2507_s6 + $0xa8] sm:$0xff] %vm1414_vm12, %v1370_v19  ;;  %1422 = vst.msk [vmem:[%s2507_s6 + $0x38] sm:$0xff] %vm1414_vm12, %v1663_v12  ;;  %v1306_v35 = vpop.f32.mrb[7].mxu0 }
 0x1df   : > { %1420 = vst.msk [vmem:[%s2507_s6 + $0x28] sm:$0xff] %vm1414_vm12, %v1306_v35 }
 0x21a   : > { %v1682_v29 = vpop.f32.mrb[8].mxu1 }
 0x21b   : > { %1441 = vst.msk [vmem:[%s2507_s6 + $0xd0] sm:$0xff] %vm1414_vm12, %v1682_v29  ;;  %v1383_v60 = vpop.f32.mrb[9].mxu1  ;;  %v1666_v40 = vpop.f32.mrb[8].mxu0 }
 0x21c   : > { %1439 = vst.msk [vmem:[%s2507_s6 + $0xc0] sm:$0xff] %vm1414_vm12, %v1383_v60  ;;  %v1683_v0 = vpop.f32.mrb[10].mxu1  ;;  %1425 = vst.msk [vmem:[%s2507_s6 + $0x50] sm:$0xff] %vm1414_vm12, %v1666_v40  ;;  %v1319_v6 = vpop.f32.mrb[9].mxu0 }
 0x21d   : > { %1442 = vst.msk [vmem:[%s2507_s6 + $0xd8] sm:$0xff] %vm1414_vm12, %v1683_v0  ;;  %v1386_v23 = vpop.f32.mrb[11].mxu1  ;;  %1423 = vst.msk [vmem:[%s2507_s6 + $0x40] sm:$0xff] %vm1414_vm12, %v1319_v6  ;;  %v1667_v53 = vpop.f32.mrb[10].mxu0 }
 0x21e   : > { %1440 = vst.msk [vmem:[%s2507_s6 + $0xc8] sm:$0xff] %vm1414_vm12, %v1386_v23  ;;  %1426 = vst.msk [vmem:[%s2507_s6 + $0x58] sm:$0xff] %vm1414_vm12, %v1667_v53  ;;  %v1322_v34 = vpop.f32.mrb[11].mxu0 }
 0x21f   : > { %1424 = vst.msk [vmem:[%s2507_s6 + $0x48] sm:$0xff] %vm1414_vm12, %v1322_v34 }
 0x256   : > { %v1686_v52 = vpop.f32.mrb[12].mxu1 }
 0x257   : > { %1445 = vst.msk [vmem:[%s2507_s6 + $0xf0] sm:$0xff] %vm1414_vm12, %v1686_v52  ;;  %v1399_v50 = vpop.f32.mrb[13].mxu1  ;;  %v1670_v7 = vpop.f32.mrb[12].mxu0 }
 0x258   : > { %1443 = vst.msk [vmem:[%s2507_s6 + $0xe0] sm:$0xff] %vm1414_vm12, %v1399_v50  ;;  %v1687_v2 = vpop.f32.mrb[14].mxu1  ;;  %1429 = vst.msk [vmem:[%s2507_s6 + $0x70] sm:$0xff] %vm1414_vm12, %v1670_v7  ;;  %v1335_v47 = vpop.f32.mrb[13].mxu0 }
 0x259   : > { %1446 = vst.msk [vmem:[%s2507_s6 + $0xf8] sm:$0xff] %vm1414_vm12, %v1687_v2  ;;  %v1402_v38 = vpop.f32.mrb[15].mxu1  ;;  %1427 = vst.msk [vmem:[%s2507_s6 + $0x60] sm:$0xff] %vm1414_vm12, %v1335_v47  ;;  %v1671_v8 = vpop.f32.mrb[14].mxu0 }
 0x25a   : > { %1444 = vst.msk [vmem:[%s2507_s6 + $0xe8] sm:$0xff] %vm1414_vm12, %v1402_v38  ;;  %1430 = vst.msk [vmem:[%s2507_s6 + $0x78] sm:$0xff] %vm1414_vm12, %v1671_v8  ;;  %v1338_v20 = vpop.f32.mrb[15].mxu0 }
 0x25b   : > { %1428 = vst.msk [vmem:[%s2507_s6 + $0x68] sm:$0xff] %vm1414_vm12, %v1338_v20 }
 0x25c PF: > { %s12_s11 = sadd.s32 1, %s1791_s11   ;;  %s2585_s9 = smov %s1787_s10 }
 0x25d   : > { %p9_p5 = scmp.ge.s32.totalorder %s12_s11, 4   ;;  %s2586_s10 = smov %s2588_s12 }
 0x25f   :  { %11 = sbr.rel (!%p9_p5) target bundleno = 2 (0x2), region = 62 }

</bundles_post_ra>
